<compile_context>
chip_gen: v7x
topology: tpu7x:2x2x1
jax: 0.10.0
libtpu: 0.0.40
codegen_flags: <defaults>
</compile_context>

<pallas_src>
import functools
import math

import jax
import jax.numpy as jnp
from jax.experimental import pallas as pl
from jax.experimental.pallas import tpu as pltpu

LN_EPS = 1e-5
_LANE = 128
_SUBLANE = 8


def _merge_ln_reduce_kernel(eh_ref, oh_ref, w_eh_ref, w_oh_ref, bias_ref, o_ref):
    # eh_ref : (TH, 1, W2, 2C)  even-H rows -> per-token [x0 | x2]
    # oh_ref : (TH, 1, W2, 2C)  odd-H  rows -> per-token [x1 | x3]
    # w_eh   : (2C, WIDTH)      gamma-folded weight rows for [x0 | x2]
    # w_oh   : (2C, WIDTH)      gamma-folded weight rows for [x1 | x3]
    # bias   : (1, WIDTH)       beta @ W (folded LayerNorm bias)
    # o_ref  : (TM, WIDTH)      TM = TH * W2 merged tokens
    th, _, w2, c2 = eh_ref.shape
    tm = th * w2

    # When W2 % 8 == 0 (all shapes exercised below) this collapse preserves the
    # (8,128) sublane tiling and lowers without a relayout copy.
    # TODO(synk): for W2 % 8 != 0 (Swin W2=7/14/28) this reshape relayouts in
    # VMEM; a 3-D last-axis contraction would avoid it once Mosaic supports
    # non-batched 3-D x 2-D dot_general.
    a = eh_ref[...].reshape(tm, c2)
    b = oh_ref[...].reshape(tm, c2)
    af = a.astype(jnp.float32)
    bf = b.astype(jnp.float32)

    # Single-pass LayerNorm statistics over the (virtual) 4C feature axis.
    inv_n = 1.0 / (2.0 * c2)  # == 1 / (4*C)
    s = jnp.sum(af, axis=-1, keepdims=True) + jnp.sum(bf, axis=-1, keepdims=True)
    ss = jnp.sum(af * af, axis=-1, keepdims=True) + jnp.sum(bf * bf, axis=-1, keepdims=True)
    mean = s * inv_n
    var = jnp.maximum(ss * inv_n - mean * mean, 0.0)
    rstd = jax.lax.rsqrt(var + LN_EPS)

    # Normalize in f32, feed the MXU in the weight dtype (bf16-friendly path).
    an = ((af - mean) * rstd).astype(w_eh_ref.dtype)
    bn = ((bf - mean) * rstd).astype(w_oh_ref.dtype)

    acc = jnp.dot(an, w_eh_ref[...], preferred_element_type=jnp.float32)
    acc = acc + jnp.dot(bn, w_oh_ref[...], preferred_element_type=jnp.float32)
    acc = acc + bias_ref[...].astype(jnp.float32)
    o_ref[...] = acc.astype(o_ref.dtype)


def _vmem_capacity_bytes():
    """Physical VMEM per TensorCore (generation-aware), best effort."""
    try:
        v = getattr(pltpu.get_tpu_info(), "vmem_capacity_bytes", None)
        if v:
            return int(v)
    except Exception:
        pass
    try:
        kind = jax.devices()[0].device_kind.lower()
    except Exception:
        kind = ""
    if any(t in kind for t in ("7x", "v7")):
        return 64 << 20
    if any(t in kind for t in ("v4", "v5", "v6")):
        return 128 << 20
    return 64 << 20  # unknown: be conservative


def _num_tensorcores():
    """TensorCores per chip (megacore sharding of the 'parallel' grid axis)."""
    try:
        info = pltpu.get_tpu_info()
        for name in ("num_cores", "tensor_cores_per_chip", "cores_per_chip"):
            v = getattr(info, name, None)
            if isinstance(v, int) and v > 0:
                return v
    except Exception:
        pass
    try:
        kind = jax.devices()[0].device_kind.lower()
    except Exception:
        kind = ""
    return 2 if any(t in kind for t in ("v4", "v5p", "7x", "v7")) else 1


def _pick_row_tile(bh2, w2, target_tokens, num_cores):
    """Pick TH (rows of merged H) so TH*W2 stays sublane-aligned and in budget."""
    g = 8 // math.gcd(w2, _SUBLANE)  # TH granularity keeping (TH*W2) % 8 == 0
    th = max(1, min(bh2, max(1, target_tokens // max(w2, 1))))
    if num_cores > 1 and bh2 >= 2 * g:
        th = min(th, max(g, bh2 // num_cores))  # give every TensorCore work
    th = max(g, (th // g) * g)
    if th >= bh2:
        return bh2  # single full block: TM == n_tok, always layout-legal
    return th


def patch_merging_forward(x, H, W, gamma, beta, weight_t, *,
                          row_tile=None, matmul_dtype=None):
    """JAX/Pallas equivalent of PatchMerging.forward.

    x        : (B, H*W, C)
    gamma    : (4C,)    LayerNorm weight
    beta     : (4C,)    LayerNorm bias
    weight_t : (4C, 2C) reduction weight, transposed so y = x @ weight_t
    returns  : (B, ceil(H/2)*ceil(W/2), 2C)
    """
    B, L, C = x.shape
    assert L == H * W, "input feature has wrong size"
    c2 = 2 * C
    x = x.reshape(B, H, W, C)

    # Same semantics as F.pad(x, (0, 0, 0, W % 2, 0, H % 2)).
    if (H % 2) or (W % 2):
        x = jnp.pad(x, ((0, 0), (0, H % 2), (0, W % 2), (0, 0)))
    Hp, Wp = x.shape[1], x.shape[2]
    H2, W2 = Hp // 2, Wp // 2
    bh2 = B * H2
    n_tok = bh2 * W2

    # Zero-copy view exposing the 2x2 merge structure:
    #   (B, Hp, Wp, C) -> (B*H2, h_parity, W2, 2*C)
    # The last dim packs (w_parity, C): even-h slice of a token is the
    # contiguous pair [x0 | x2], the odd-h slice is [x1 | x3].
    xr = x.reshape(bh2, 2, W2, c2)

    # Fold LayerNorm affine into the reduction (one-time, tiny precompute):
    #   (xn*gamma + beta) @ W == xn @ (gamma[:,None]*W) + beta @ W
    w_f = (weight_t.astype(jnp.float32) * gamma.astype(jnp.float32)[:, None]).astype(
        weight_t.dtype
    )
    bias_f = beta.astype(jnp.float32) @ weight_t.astype(jnp.float32)  # (2C,)
    # Re-order weight rows to match the in-kernel [x0|x2] / [x1|x3] packing.
    w_eh = jnp.concatenate([w_f[0:C], w_f[2 * C:3 * C]], axis=0)       # (2C, 2C)
    w_oh = jnp.concatenate([w_f[C:2 * C], w_f[3 * C:4 * C]], axis=0)   # (2C, 2C)
    if matmul_dtype is not None:  # e.g. bf16 MXU feed on v5e (accuracy permitting)
        w_eh = w_eh.astype(matmul_dtype)
        w_oh = w_oh.astype(matmul_dtype)

    # Output width: pad to 128 lanes only when 2C < 128 (fully-masked narrow
    # stores are the one case worth padding).  For 2C >= 128 emit the true
    # 2C-wide output — at most one masked tail store per row, no unpad pass.
    if c2 < _LANE:
        width = _LANE
        w_eh = jnp.pad(w_eh, ((0, 0), (0, width - c2)))
        w_oh = jnp.pad(w_oh, ((0, 0), (0, width - c2)))
        bias_f = jnp.pad(bias_f, (0, width - c2))
    else:
        width = c2
    bias_f = bias_f.reshape(1, width).astype(jnp.float32)

    # --- Generation-aware tile sizing under an honest VMEM budget. ---
    cap = _vmem_capacity_bytes()
    ncores = _num_tensorcores()
    if row_tile is None:
        row_tile = 2048 if cap >= (96 << 20) else 1024

    in_isz = jnp.dtype(x.dtype).itemsize
    w_isz = jnp.dtype(w_eh.dtype).itemsize
    out_isz = in_isz
    # Per merged token: double-buffered I/O streams + f32 compute temporaries
    # (af, bf, squares, an, bn, acc).
    per_tok = (2 * 2 * c2 * in_isz          # two parity input blocks, 2 buffers
               + 2 * width * out_isz        # output block, 2 buffers
               + (6 * c2 + width) * 4)      # in-kernel f32 scratch estimate
    weight_bytes = 2 * (2 * c2 * width * w_isz + width * 4)  # 2 mats + bias, 2 bufs
    usable = int(cap * 0.70)                # leave Mosaic internal headroom
    stream_budget = max(2 << 20, usable - weight_bytes)
    target_tokens = max(W2, min(row_tile, stream_budget // max(per_tok, 1)))

    th = _pick_row_tile(bh2, W2, target_tokens, ncores)
    tm = th * W2
    grid = (pl.cdiv(bh2, th),)

    vmem_limit = tm * per_tok + weight_bytes + (4 << 20)
    vmem_limit = int(min(max(vmem_limit, 32 << 20), int(cap * 0.9)))

    flops = 2 * n_tok * (4 * C) * (2 * C)
    bytes_accessed = (n_tok * (4 * C * in_isz + width * out_isz)
                      + 2 * c2 * width * w_isz + width * 4)
    cost = pl.CostEstimate(flops=flops, transcendentals=n_tok,
                           bytes_accessed=bytes_accessed)

    in_specs = [
        # Even-H parity rows of the merged view -> [x0 | x2] per token.
        pl.BlockSpec((th, 1, W2, c2), lambda i: (i, 0, 0, 0)),
        # Odd-H parity rows -> [x1 | x3] per token (same array, different view).
        pl.BlockSpec((th, 1, W2, c2), lambda i: (i, 1, 0, 0)),
        pl.BlockSpec((c2, width), lambda i: (0, 0)),
        pl.BlockSpec((c2, width), lambda i: (0, 0)),
        pl.BlockSpec((1, width), lambda i: (0, 0)),
    ]
    out_specs = pl.BlockSpec((tm, width), lambda i: (i, 0))

    out2d = pl.pallas_call(
        _merge_ln_reduce_kernel,
        out_shape=jax.ShapeDtypeStruct((n_tok, width), x.dtype),
        grid_spec=pltpu.PrefetchScalarGridSpec(
            num_scalar_prefetch=0,
            grid=grid,
            in_specs=in_specs,
            out_specs=out_specs,
        ),
        compiler_params=pltpu.CompilerParams(
            dimension_semantics=("parallel",),
            vmem_limit_bytes=vmem_limit,
        ),
        cost_estimate=cost,
    )(xr, xr, w_eh, w_oh, bias_f)

    out = out2d if width == c2 else out2d[:, :c2]
    return out.reshape(B, H2 * W2, c2)


def _reference(x, H, W, gamma, beta, weight_t):
    B, L, C = x.shape
    xr = x.reshape(B, H, W, C)
    if (H % 2) or (W % 2):
        xr = jnp.pad(xr, ((0, 0), (0, H % 2), (0, W % 2), (0, 0)))
    x0 = xr[:, 0::2, 0::2, :]
    x1 = xr[:, 1::2, 0::2, :]
    x2 = xr[:, 0::2, 1::2, :]
    x3 = xr[:, 1::2, 1::2, :]
    xm = jnp.concatenate([x0, x1, x2, x3], axis=-1).reshape(B, -1, 4 * C)
    xm = xm.astype(jnp.float32)
    mean = jnp.mean(xm, axis=-1, keepdims=True)
    var = jnp.mean(jnp.square(xm - mean), axis=-1, keepdims=True)
    xn = (xm - mean) * jax.lax.rsqrt(var + LN_EPS)
    y = xn * gamma.astype(jnp.float32) + beta.astype(jnp.float32)
    out = jnp.einsum(
        "blk,kd->bld", y, weight_t.astype(jnp.float32),
        precision=jax.lax.Precision.HIGHEST,
    )
    return out.astype(x.dtype)


if __name__ == "__main__":
    key = jax.random.PRNGKey(0)
    k_x, k_w, k_g, k_b, k_x2 = jax.random.split(key, 5)

    # Small, module-consistent shapes: dim=C=32, B=2, H=W=16 -> x: (2, 256, 32)
    B, H, W, C = 2, 16, 16, 32
    x = jax.random.normal(k_x, (B, H * W, C), dtype=jnp.float32)

    # nn.Linear(4C, 2C, bias=False): torch weight is (2C, 4C); store transposed.
    bound = 1.0 / jnp.sqrt(4.0 * C)
    weight_t = jax.random.uniform(
        k_w, (4 * C, 2 * C), minval=-bound, maxval=bound, dtype=jnp.float32
    )
    # nn.LayerNorm(4C): default weight=1, bias=0; perturb so affine is exercised.
    gamma = jnp.ones((4 * C,), jnp.float32) + 0.01 * jax.random.normal(k_g, (4 * C,))
    beta = 0.01 * jax.random.normal(k_b, (4 * C,))

    fwd = jax.jit(functools.partial(patch_merging_forward, H=H, W=W))
    out = jax.block_until_ready(fwd(x, gamma=gamma, beta=beta, weight_t=weight_t))
    ref = _reference(x, H, W, gamma, beta, weight_t)
    assert out.shape == (B, (H // 2) * (W // 2), 2 * C), out.shape
    assert jnp.allclose(out, ref, atol=2e-4, rtol=2e-4), float(
        jnp.max(jnp.abs(out - ref))
    )

    # Odd-H input exercises the zero-pad branch (F.pad equivalent).
    Ho, Wo = 15, 16
    x_odd = jax.random.normal(k_x2, (B, Ho * Wo, C), dtype=jnp.float32)
    fwd_odd = jax.jit(functools.partial(patch_merging_forward, H=Ho, W=Wo))
    out_odd = jax.block_until_ready(
        fwd_odd(x_odd, gamma=gamma, beta=beta, weight_t=weight_t)
    )
    ref_odd = _reference(x_odd, Ho, Wo, gamma, beta, weight_t)
    assert out_odd.shape == (B, ((Ho + 1) // 2) * (Wo // 2), 2 * C), out_odd.shape
    assert jnp.allclose(out_odd, ref_odd, atol=2e-4, rtol=2e-4), float(
        jnp.max(jnp.abs(out_odd - ref_odd))
    )

    print("KERNEL_OK")
</pallas_src>

<mosaic_0001>
module attributes {stable_mosaic.version = 11 : i64} {
  func.func @_merge_ln_reduce_kernel(%arg0: i32, %arg1: memref<16x1x8x64xf32, #tpu.memory_space<vmem>>, %arg2: memref<16x1x8x64xf32, #tpu.memory_space<vmem>>, %arg3: memref<64x128xf32, #tpu.memory_space<vmem>>, %arg4: memref<64x128xf32, #tpu.memory_space<vmem>>, %arg5: memref<1x128xf32, #tpu.memory_space<vmem>>, %arg6: memref<128x128xf32, #tpu.memory_space<vmem>>) attributes {dimension_semantics = [#tpu.dimension_semantics<parallel>], iteration_bounds = array<i64: 1>, scalar_prefetch = 0 : i64, scratch_operands = 0 : i64, tpu.core_type = #tpu.core_type<tc>, window_params = [{transform_indices = @transform_0, window_bounds = array<i64: 16, 1, 8, 64>}, {transform_indices = @transform_1, window_bounds = array<i64: 16, 1, 8, 64>}, {pipeline_mode = #tpu.pipeline_mode<synchronous>, transform_indices = @transform_2, window_bounds = array<i64: 64, 128>}, {pipeline_mode = #tpu.pipeline_mode<synchronous>, transform_indices = @transform_3, window_bounds = array<i64: 64, 128>}, {pipeline_mode = #tpu.pipeline_mode<synchronous>, transform_indices = @transform_4, window_bounds = array<i64: 1, 128>}, {transform_indices = @transform_5, window_bounds = array<i64: 128, 128>}]} {
    %c0 = arith.constant 0 : index
    %c0_0 = arith.constant 0 : index
    %c0_1 = arith.constant 0 : index
    %c0_2 = arith.constant 0 : index
    %0 = vector.load %arg1[%c0, %c0_0, %c0_1, %c0_2] : memref<16x1x8x64xf32, #tpu.memory_space<vmem>>, vector<16x1x8x64xf32>
    %1 = vector.shape_cast %0 : vector<16x1x8x64xf32> to vector<128x64xf32>
    %c0_3 = arith.constant 0 : index
    %c0_4 = arith.constant 0 : index
    %c0_5 = arith.constant 0 : index
    %c0_6 = arith.constant 0 : index
    %2 = vector.load %arg2[%c0_3, %c0_4, %c0_5, %c0_6] : memref<16x1x8x64xf32, #tpu.memory_space<vmem>>, vector<16x1x8x64xf32>
    %3 = vector.shape_cast %2 : vector<16x1x8x64xf32> to vector<128x64xf32>
    %cst = arith.constant dense<0.000000e+00> : vector<128xf32>
    %4 = vector.multi_reduction <add>, %1, %cst [1] : vector<128x64xf32> to vector<128xf32>
    %5 = vector.shape_cast %4 : vector<128xf32> to vector<128x1xf32>
    %cst_7 = arith.constant dense<0.000000e+00> : vector<128xf32>
    %6 = vector.multi_reduction <add>, %3, %cst_7 [1] : vector<128x64xf32> to vector<128xf32>
    %7 = vector.shape_cast %6 : vector<128xf32> to vector<128x1xf32>
    %8 = arith.addf %5, %7 : vector<128x1xf32>
    %9 = arith.mulf %1, %1 : vector<128x64xf32>
    %cst_8 = arith.constant dense<0.000000e+00> : vector<128xf32>
    %10 = vector.multi_reduction <add>, %9, %cst_8 [1] : vector<128x64xf32> to vector<128xf32>
    %11 = vector.shape_cast %10 : vector<128xf32> to vector<128x1xf32>
    %12 = arith.mulf %3, %3 : vector<128x64xf32>
    %cst_9 = arith.constant dense<0.000000e+00> : vector<128xf32>
    %13 = vector.multi_reduction <add>, %12, %cst_9 [1] : vector<128x64xf32> to vector<128xf32>
    %14 = vector.shape_cast %13 : vector<128xf32> to vector<128x1xf32>
    %15 = arith.addf %11, %14 : vector<128x1xf32>
    %cst_10 = arith.constant 7.812500e-03 : f32
    %16 = vector.broadcast %cst_10 : f32 to vector<128x1xf32>
    %17 = arith.mulf %8, %16 : vector<128x1xf32>
    %cst_11 = arith.constant 7.812500e-03 : f32
    %18 = vector.broadcast %cst_11 : f32 to vector<128x1xf32>
    %19 = arith.mulf %15, %18 : vector<128x1xf32>
    %20 = arith.mulf %17, %17 : vector<128x1xf32>
    %21 = arith.subf %19, %20 : vector<128x1xf32>
    %cst_12 = arith.constant 0.000000e+00 : f32
    %22 = vector.broadcast %cst_12 : f32 to vector<128x1xf32>
    %23 = arith.maximumf %21, %22 : vector<128x1xf32>
    %cst_13 = arith.constant 9.99999974E-6 : f32
    %24 = vector.broadcast %cst_13 : f32 to vector<128x1xf32>
    %25 = arith.addf %23, %24 : vector<128x1xf32>
    %26 = math.rsqrt %25 : vector<128x1xf32>
    %27 = vector.broadcast %17 : vector<128x1xf32> to vector<128x64xf32>
    %28 = arith.subf %1, %27 : vector<128x64xf32>
    %29 = vector.broadcast %26 : vector<128x1xf32> to vector<128x64xf32>
    %30 = arith.mulf %28, %29 : vector<128x64xf32>
    %31 = vector.broadcast %17 : vector<128x1xf32> to vector<128x64xf32>
    %32 = arith.subf %3, %31 : vector<128x64xf32>
    %33 = vector.broadcast %26 : vector<128x1xf32> to vector<128x64xf32>
    %34 = arith.mulf %32, %33 : vector<128x64xf32>
    %c0_14 = arith.constant 0 : index
    %c0_15 = arith.constant 0 : index
    %35 = vector.load %arg3[%c0_14, %c0_15] : memref<64x128xf32, #tpu.memory_space<vmem>>, vector<64x128xf32>
    %cst_16 = arith.constant dense<0.000000e+00> : vector<128x128xf32>
    %36 = tpu.matmul %30, %35, %cst_16 {dimension_numbers = #tpu.dot_dimension_numbers<[1], [0], [0], [1], [0, 0, 1, 1], [], []>} : vector<128x64xf32>, vector<64x128xf32>, vector<128x128xf32> -> vector<128x128xf32>
    %c0_17 = arith.constant 0 : index
    %c0_18 = arith.constant 0 : index
    %37 = vector.load %arg4[%c0_17, %c0_18] : memref<64x128xf32, #tpu.memory_space<vmem>>, vector<64x128xf32>
    %cst_19 = arith.constant dense<0.000000e+00> : vector<128x128xf32>
    %38 = tpu.matmul %34, %37, %cst_19 {dimension_numbers = #tpu.dot_dimension_numbers<[1], [0], [0], [1], [0, 0, 1, 1], [], []>} : vector<128x64xf32>, vector<64x128xf32>, vector<128x128xf32> -> vector<128x128xf32>
    %39 = arith.addf %36, %38 : vector<128x128xf32>
    %c0_20 = arith.constant 0 : index
    %c0_21 = arith.constant 0 : index
    %40 = vector.load %arg5[%c0_20, %c0_21] : memref<1x128xf32, #tpu.memory_space<vmem>>, vector<1x128xf32>
    %41 = vector.broadcast %40 : vector<1x128xf32> to vector<128x128xf32>
    %42 = arith.addf %39, %41 : vector<128x128xf32>
    %c0_22 = arith.constant 0 : index
    %c0_23 = arith.constant 0 : index
    %43 = vector.load %arg6[%c0_22, %c0_23] : memref<128x128xf32, #tpu.memory_space<vmem>>, vector<128x128xf32>
    tpu.vector_store %arg6[%c0_22, %c0_23], %42 {strides = array<i32>} : memref<128x128xf32, #tpu.memory_space<vmem>>, vector<128x128xf32>,
    return
  }
  func.func @transform_0(%arg0: i32) -> (i32, i32, i32, i32) {
    %c0_i32 = arith.constant 0 : i32
    %c0_i32_0 = arith.constant 0 : i32
    %c0_i32_1 = arith.constant 0 : i32
    %c0_i32_2 = arith.constant 0 : i32
    return %arg0, %c0_i32, %c0_i32_0, %c0_i32_1 : i32, i32, i32, i32
  }
  func.func @transform_1(%arg0: i32) -> (i32, i32, i32, i32) {
    %c1_i32 = arith.constant 1 : i32
    %c0_i32 = arith.constant 0 : i32
    %c0_i32_0 = arith.constant 0 : i32
    %c0_i32_1 = arith.constant 0 : i32
    return %arg0, %c1_i32, %c0_i32, %c0_i32_0 : i32, i32, i32, i32
  }
  func.func @transform_2(%arg0: i32) -> (i32, i32) {
    %c0_i32 = arith.constant 0 : i32
    %c0_i32_0 = arith.constant 0 : i32
    %c0_i32_1 = arith.constant 0 : i32
    return %c0_i32, %c0_i32_0 : i32, i32
  }
  func.func @transform_3(%arg0: i32) -> (i32, i32) {
    %c0_i32 = arith.constant 0 : i32
    %c0_i32_0 = arith.constant 0 : i32
    %c0_i32_1 = arith.constant 0 : i32
    return %c0_i32, %c0_i32_0 : i32, i32
  }
  func.func @transform_4(%arg0: i32) -> (i32, i32) {
    %c0_i32 = arith.constant 0 : i32
    %c0_i32_0 = arith.constant 0 : i32
    %c0_i32_1 = arith.constant 0 : i32
    return %c0_i32, %c0_i32_0 : i32, i32
  }
  func.func @transform_5(%arg0: i32) -> (i32, i32) {
    %c0_i32 = arith.constant 0 : i32
    %c0_i32_0 = arith.constant 0 : i32
    return %arg0, %c0_i32 : i32, i32
  }
}

</mosaic_0001>

<bundles_post_ra>
// kernel: patch_merging_forward.1
= control target key start
LH: loop header
LB: loop body
LE: loop exit
PB: predicated region body
PF: predicated region fallthrough
CT: control target
= control target key end

     0   :  { %vm242_vm0 = vcmask 523264   ;;  %s1958_s0 = inlined_call_operand.vmem [shape: f32[16,2,8,64], index: 0, kind: input, shape index: {}, may-alias: {0,1}]   ;;  %s1959_s1 = inlined_call_operand.vmem [shape: f32[16,2,8,64], index: 1, kind: input, shape index: {}, may-alias: {0,1}]   ;;  %s1960_s2 = inlined_call_operand.vmem [shape: f32[64,128], index: 2, kind: input, shape index: {}]   ;;  %s1961_s3 = inlined_call_operand.vmem [shape: f32[64,128], index: 3, kind: input, shape index: {}]   ;;  %s1962_s4 = inlined_call_operand.vmem [shape: f32[1,128], index: 4, kind: input, shape index: {}]   ;;  %s1963_s5 = inlined_call_operand.hbm [shape: f32[128,128], index: 5, kind: output, shape index: {}]  }
   0x1   :  { %v1460_v0 = vld [vmem:[%s1958_s0 + $0x10] sm:$0xff]  ;;  %v1465_v1 = vld [vmem:[%s1958_s0] sm:$0xff]  ;;  %v1470_v2 = vld [vmem:[%s1959_s1 + $0x18] sm:$0xff] }
   0x2   :  { %v246_v3 = vsel %vm242_vm0, %v1460_v0, 0.0  ;;  %v243_v4 = vsel %vm242_vm0, %v1465_v1, 0.0  ;;  %v1479_v5 = vld [vmem:[%s1959_s1 + $0x8] sm:$0xff]  ;;  %v294_v6 = vsel %vm242_vm0, %v1470_v2, 0.0  ;;  %v355_v9 = vmul.f32 %v1465_v1, %v1465_v1  ;;  %v1505_v17 = vld [vmem:[%s1958_s0 + $0x20] sm:$0xff] }
   0x3   :  { %247 = vadd.xlane.f32.xlu1 %v246_v3  ;;  %244 = vadd.xlane.f32.xlu0 %v243_v4  ;;  %v291_v7 = vsel %vm242_vm0, %v1479_v5, 0.0  ;;  %v419_v8 = vmul.f32 %v1479_v5, %v1479_v5  ;;  %v420_v12 = vmul.f32 %v1470_v2, %v1470_v2  ;;  %v356_v13 = vmul.f32 %v1460_v0, %v1460_v0  ;;  %v1500_v16 = vld [vmem:[%s1959_s1 + $0x28] sm:$0xff] }
   0x4   :  { %v371_v11 = vsel %vm242_vm0, %v355_v9, 0.0 }
   0x5   :  { %v435_v10 = vsel %vm242_vm0, %v419_v8, 0.0  ;;  %v438_v14 = vsel %vm242_vm0, %v420_v12, 0.0  ;;  %v374_v15 = vsel %vm242_vm0, %v356_v13, 0.0 }
   0x7   :  { %295 = vadd.xlane.f32.xlu1 %v294_v6  ;;  %292 = vadd.xlane.f32.xlu0 %v291_v7 }
   0xb   :  { %436 = vadd.xlane.f32.xlu1 %v435_v10  ;;  %372 = vadd.xlane.f32.xlu0 %v371_v11 }
   0xc   :  { %10 = vsyncpa [#allocation5], 0  ;;  %v297_v18 = vsel %vm242_vm0, %v1500_v16, 0.0  ;;  %v249_v19 = vsel %vm242_vm0, %v1505_v17, 0.0  ;;  %v1514_v20 = vld [vmem:[%s1959_s1 + $0x38] sm:$0xff]  ;;  %v1519_v21 = vld [vmem:[%s1958_s0 + $0x30] sm:$0xff]  ;;  %v421_v24 = vmul.f32 %v1500_v16, %v1500_v16  ;;  %v357_v25 = vmul.f32 %v1505_v17, %v1505_v17 }
   0xd   :  { %v300_v22 = vsel %vm242_vm0, %v1514_v20, 0.0  ;;  %v252_v23 = vsel %vm242_vm0, %v1519_v21, 0.0  ;;  %v422_v28 = vmul.f32 %v1514_v20, %v1514_v20  ;;  %v358_v29 = vmul.f32 %v1519_v21, %v1519_v21  ;;  %v1540_v32 = vld [vmem:[%s1959_s1 + $0x48] sm:$0xff]  ;;  %v1545_v33 = vld [vmem:[%s1958_s0 + $0x40] sm:$0xff]  ;;  %v1554_v36 = vld [vmem:[%s1959_s1 + $0x58] sm:$0xff] }
   0xe   :  { %v441_v26 = vsel %vm242_vm0, %v421_v24, 0.0  ;;  %v377_v27 = vsel %vm242_vm0, %v357_v25, 0.0  ;;  %v303_v34 = vsel %vm242_vm0, %v1540_v32, 0.0  ;;  %v255_v35 = vsel %vm242_vm0, %v1545_v33, 0.0  ;;  %v1559_v37 = vld [vmem:[%s1958_s0 + $0x50] sm:$0xff]  ;;  %v683_v38 = vld [vmem:[%s1961_s3] sm:$0xff] }
   0xf   :  { %439 = vadd.xlane.f32.xlu1 %v438_v14  ;;  %375 = vadd.xlane.f32.xlu0 %v374_v15  ;;  %v444_v30 = vsel %vm242_vm0, %v422_v28, 0.0  ;;  %v380_v31 = vsel %vm242_vm0, %v358_v29, 0.0  ;;  %v684_v39 = vld [vmem:[%s1961_s3 + $0x8] sm:$0xff]  ;;  %v675_v40 = vld [vmem:[%s1960_s2] sm:$0xff]  ;;  %v306_v41 = vsel %vm242_vm0, %v1554_v36, 0.0  ;;  %v258_v44 = vsel %vm242_vm0, %v1559_v37, 0.0 }
  0x10   :  { %v1317_v42 = vpack.c.bf16 %v684_v39, %v683_v38  ;;  %v676_v43 = vld [vmem:[%s1960_s2 + $0x8] sm:$0xff]  ;;  %v423_v45 = vmul.f32 %v1540_v32, %v1540_v32  ;;  %v359_v46 = vmul.f32 %v1545_v33, %v1545_v33  ;;  %v685_v48 = vld [vmem:[%s1961_s3 + $0x10] sm:$0xff]  ;;  %v686_v49 = vld [vmem:[%s1961_s3 + $0x18] sm:$0xff]  ;;  %v424_v51 = vmul.f32 %v1554_v36, %v1554_v36 }
  0x11   :  { %v1333_v47 = vpack.c.bf16 %v676_v43, %v675_v40  ;;  %v677_v50 = vld [vmem:[%s1960_s2 + $0x10] sm:$0xff]  ;;  %v1321_v52 = vpack.c.bf16 %v686_v49, %v685_v48  ;;  %v678_v53 = vld [vmem:[%s1960_s2 + $0x18] sm:$0xff]  ;;  %v360_v56 = vmul.f32 %v1559_v37, %v1559_v37  ;;  %v687_v58 = vld [vmem:[%s1961_s3 + $0x20] sm:$0xff] }
  0x12   :  { %1318 = vmatprep.subr.bf16.mxu1 %v1317_v42  ;;  %v447_v54 = vsel %vm242_vm0, %v423_v45, 0.0  ;;  %v383_v55 = vsel %vm242_vm0, %v359_v46, 0.0  ;;  %v1337_v57 = vpack.c.bf16 %v678_v53, %v677_v50  ;;  %v688_v59 = vld [vmem:[%s1961_s3 + $0x28] sm:$0xff]  ;;  %v679_v60 = vld [vmem:[%s1960_s2 + $0x20] sm:$0xff]  ;;  %v450_v63 = vsel %vm242_vm0, %v424_v51, 0.0  ;;  %v689_v8 = vld [vmem:[%s1961_s3 + $0x30] sm:$0xff] }
  0x13   :  { %298 = vadd.xlane.f32.xlu1 %v297_v18  ;;  %250 = vadd.xlane.f32.xlu0 %v249_v19  ;;  %v1325_v61 = vpack.c.bf16 %v688_v59, %v687_v58  ;;  %v680_v62 = vld [vmem:[%s1960_s2 + $0x28] sm:$0xff]  ;;  %v386_v3 = vsel %vm242_vm0, %v360_v56, 0.0  ;;  %v1621_v7 = vld [vmem:[%s1958_s0 + $0x60] sm:$0xff]  ;;  %v690_v9 = vld [vmem:[%s1961_s3 + $0x38] sm:$0xff] }
  0x14   :  { %1334 = vmatprep.subr.bf16.mxu0 %v1333_v47  ;;  %1320 = vmatpush3.bf16.msra.mxu1 %v1317_v42  ;;  %v1341_v4 = vpack.c.bf16 %v680_v62, %v679_v60  ;;  %v1616_v6 = vld [vmem:[%s1959_s1 + $0x68] sm:$0xff]  ;;  %v681_v10 = vld [vmem:[%s1960_s2 + $0x30] sm:$0xff]  ;;  %v1329_v11 = vpack.c.bf16 %v690_v9, %v689_v8  ;;  %v682_v12 = vld [vmem:[%s1960_s2 + $0x38] sm:$0xff]  ;;  %v261_v14 = vsel %vm242_vm0, %v1621_v7, 0.0  ;;  %v361_v25 = vmul.f32 %v1621_v7, %v1621_v7 }
  0x15   :  { %1336 = vmatpush3.bf16.msra.mxu0 %v1333_v47  ;;  %1322 = vmatprep.subr.bf16.mxu1 %v1321_v52  ;;  %v309_v13 = vsel %vm242_vm0, %v1616_v6, 0.0  ;;  %v1345_v15 = vpack.c.bf16 %v682_v12, %v681_v10  ;;  %v1642_v18 = vld [vmem:[%s1959_s1 + $0x78] sm:$0xff]  ;;  %v1647_v19 = vld [vmem:[%s1958_s0 + $0x70] sm:$0xff]  ;;  %v425_v24 = vmul.f32 %v1616_v6, %v1616_v6  ;;  %v1713_v53 = vld [vmem:[%s1958_s0 + $0xa0] sm:$0xff] }
  0x16   :  { %1338 = vmatprep.subr.bf16.mxu0 %v1337_v57  ;;  %v426_v28 = vmul.f32 %v1642_v18, %v1642_v18  ;;  %v362_v29 = vmul.f32 %v1647_v19, %v1647_v19  ;;  %v1682_v40 = vld [vmem:[%s1959_s1 + $0x98] sm:$0xff]  ;;  %v1748_v10 = vld [vmem:[%s1959_s1 + $0xc8] sm:$0xff] }
  0x17   :  { %301 = vadd.xlane.f32.xlu1 %v300_v22  ;;  %253 = vadd.xlane.f32.xlu0 %v252_v23  ;;  %v312_v22 = vsel %vm242_vm0, %v1642_v18, 0.0  ;;  %v264_v23 = vsel %vm242_vm0, %v1647_v19, 0.0  ;;  %v318_v42 = vsel %vm242_vm0, %v1682_v40, 0.0  ;;  %v428_v48 = vmul.f32 %v1682_v40, %v1682_v40  ;;  %v1722_v56 = vld [vmem:[%s1959_s1 + $0xb8] sm:$0xff] }
  0x18   :  { %1324 = vmatpush3.bf16.msra.mxu1 %v1321_v52  ;;  %v1708_v52 = vld [vmem:[%s1959_s1 + $0xa8] sm:$0xff]  ;;  %v324_v58 = vsel %vm242_vm0, %v1722_v56, 0.0  ;;  %v327_v12 = vsel %vm242_vm0, %v1748_v10, 0.0 }
  0x19   :  { %1340 = vmatpush3.bf16.msra.mxu0 %v1337_v57  ;;  %1326 = vmatprep.subr.bf16.mxu1 %v1325_v61  ;;  %v462_v50 = vsel %vm242_vm0, %v428_v48, 0.0  ;;  %v1727_v57 = vld [vmem:[%s1958_s0 + $0xb0] sm:$0xff]  ;;  %v429_v60 = vmul.f32 %v1708_v52, %v1708_v52 }
  0x1a   :  { %1342 = vmatprep.subr.bf16.mxu0 %v1341_v4  ;;  %v276_v59 = vsel %vm242_vm0, %v1727_v57, 0.0 }
  0x1b   :  { %442 = vadd.xlane.f32.xlu1 %v441_v26  ;;  %378 = vadd.xlane.f32.xlu0 %v377_v27  ;;  %v453_v26 = vsel %vm242_vm0, %v425_v24, 0.0  ;;  %v389_v27 = vsel %vm242_vm0, %v361_v25, 0.0  ;;  %v465_v62 = vsel %vm242_vm0, %v429_v60, 0.0  ;;  %v431_v24 = vmul.f32 %v1748_v10, %v1748_v10 }
  0x1c   :  { %1328 = vmatpush3.bf16.msra.mxu1 %v1325_v61  ;;  %v365_v61 = vmul.f32 %v1713_v53, %v1713_v53 }
  0x1d   :  { %1344 = vmatpush3.bf16.msra.mxu0 %v1341_v4  ;;  %1330 = vmatprep.subr.bf16.mxu1 %v1329_v11  ;;  %v366_v4 = vmul.f32 %v1727_v57, %v1727_v57 }
  0x1e   :  { %1346 = vmatprep.subr.bf16.mxu0 %v1345_v15 }
  0x1f   :  { %445 = vadd.xlane.f32.xlu1 %v444_v30  ;;  %381 = vadd.xlane.f32.xlu0 %v380_v31  ;;  %v456_v30 = vsel %vm242_vm0, %v426_v28, 0.0  ;;  %v392_v31 = vsel %vm242_vm0, %v362_v29, 0.0  ;;  %v404_v9 = vsel %vm242_vm0, %v366_v4, 0.0 }
  0x20   :  { %1332 = vmatpush3.bf16.msra.mxu1 %v1329_v11  ;;  %v1753_v11 = vld [vmem:[%s1958_s0 + $0xc0] sm:$0xff] }
  0x21   :  { %1348 = vmatpush3.bf16.msra.mxu0 %v1345_v15  ;;  %v1767_v15 = vld [vmem:[%s1958_s0 + $0xd0] sm:$0xff]  ;;  %v367_v25 = vmul.f32 %v1753_v11, %v1753_v11 }
  0x22   :  { %v368_v29 = vmul.f32 %v1767_v15, %v1767_v15 }
  0x23   :  { %304 = vadd.xlane.f32.xlu1 %v303_v34  ;;  %256 = vadd.xlane.f32.xlu0 %v255_v35  ;;  %v1668_v34 = vld [vmem:[%s1959_s1 + $0x88] sm:$0xff]  ;;  %v1673_v35 = vld [vmem:[%s1958_s0 + $0x80] sm:$0xff] }
  0x24   :  { %v315_v38 = vsel %vm242_vm0, %v1668_v34, 0.0  ;;  %v267_v39 = vsel %vm242_vm0, %v1673_v35, 0.0  ;;  %v363_v45 = vmul.f32 %v1673_v35, %v1673_v35 }
  0x26   :  { %v395_v47 = vsel %vm242_vm0, %v363_v45, 0.0  ;;  %v1807_v45 = vld [vmem:[%s1958_s0 + $0xf0] sm:$0xff] }
  0x27   :  { %307 = vadd.xlane.f32.xlu1 %v306_v41  ;;  %259 = vadd.xlane.f32.xlu0 %v258_v44  ;;  %v1687_v41 = vld [vmem:[%s1958_s0 + $0x90] sm:$0xff]  ;;  %v427_v44 = vmul.f32 %v1668_v34, %v1668_v34 }
  0x28   :  { %v270_v43 = vsel %vm242_vm0, %v1687_v41, 0.0  ;;  %v364_v49 = vmul.f32 %v1687_v41, %v1687_v41 }
  0x29   :  { %v459_v46 = vsel %vm242_vm0, %v427_v44, 0.0  ;;  %v1802_v44 = vld [vmem:[%s1959_s1 + $0xf8] sm:$0xff] }
  0x2a   :  { %v398_v51 = vsel %vm242_vm0, %v364_v49, 0.0 }
  0x2b   :  { %448 = vadd.xlane.f32.xlu1 %v447_v54  ;;  %384 = vadd.xlane.f32.xlu0 %v383_v55  ;;  %v321_v54 = vsel %vm242_vm0, %v1708_v52, 0.0  ;;  %v273_v55 = vsel %vm242_vm0, %v1713_v53, 0.0 }
  0x2f   :  { %451 = vadd.xlane.f32.xlu1 %v450_v63  ;;  %387 = vadd.xlane.f32.xlu0 %v386_v3  ;;  %v401_v63 = vsel %vm242_vm0, %v365_v61, 0.0  ;;  %v430_v3 = vmul.f32 %v1722_v56, %v1722_v56 }
  0x31   :  { %v468_v8 = vsel %vm242_vm0, %v430_v3, 0.0 }
  0x33   :  { %310 = vadd.xlane.f32.xlu1 %v309_v13  ;;  %262 = vadd.xlane.f32.xlu0 %v261_v14  ;;  %v279_v13 = vsel %vm242_vm0, %v1753_v11, 0.0  ;;  %v1762_v14 = vld [vmem:[%s1959_s1 + $0xd8] sm:$0xff] }
  0x34   :  { %v432_v28 = vmul.f32 %v1762_v14, %v1762_v14 }
  0x37   :  { %313 = vadd.xlane.f32.xlu1 %v312_v22  ;;  %265 = vadd.xlane.f32.xlu0 %v264_v23  ;;  %v330_v22 = vsel %vm242_vm0, %v1762_v14, 0.0  ;;  %v282_v23 = vsel %vm242_vm0, %v1767_v15, 0.0 }
  0x3b   :  { %454 = vadd.xlane.f32.xlu1 %v453_v26  ;;  %390 = vadd.xlane.f32.xlu0 %v389_v27  ;;  %v471_v26 = vsel %vm242_vm0, %v431_v24, 0.0  ;;  %v407_v27 = vsel %vm242_vm0, %v367_v25, 0.0 }
  0x3f   :  { %457 = vadd.xlane.f32.xlu1 %v456_v30  ;;  %393 = vadd.xlane.f32.xlu0 %v392_v31  ;;  %v474_v30 = vsel %vm242_vm0, %v432_v28, 0.0  ;;  %v410_v31 = vsel %vm242_vm0, %v368_v29, 0.0 }
  0x43   :  { %316 = vadd.xlane.f32.xlu1 %v315_v38  ;;  %268 = vadd.xlane.f32.xlu0 %v267_v39  ;;  %v1788_v38 = vld [vmem:[%s1959_s1 + $0xe8] sm:$0xff]  ;;  %v1793_v39 = vld [vmem:[%s1958_s0 + $0xe0] sm:$0xff] }
  0x44   :  { %v433_v48 = vmul.f32 %v1788_v38, %v1788_v38  ;;  %v369_v49 = vmul.f32 %v1793_v39, %v1793_v39 }
  0x47   :  { %319 = vadd.xlane.f32.xlu1 %v318_v42  ;;  %271 = vadd.xlane.f32.xlu0 %v270_v43  ;;  %v333_v42 = vsel %vm242_vm0, %v1788_v38, 0.0  ;;  %v285_v43 = vsel %vm242_vm0, %v1793_v39, 0.0 }
  0x4b   :  { %460 = vadd.xlane.f32.xlu1 %v459_v46  ;;  %396 = vadd.xlane.f32.xlu0 %v395_v47  ;;  %v336_v46 = vsel %vm242_vm0, %v1802_v44, 0.0  ;;  %v288_v47 = vsel %vm242_vm0, %v1807_v45, 0.0 }
  0x4f   :  { %463 = vadd.xlane.f32.xlu1 %v462_v50  ;;  %399 = vadd.xlane.f32.xlu0 %v398_v51  ;;  %v477_v50 = vsel %vm242_vm0, %v433_v48, 0.0  ;;  %v413_v51 = vsel %vm242_vm0, %v369_v49, 0.0 }
  0x53   :  { %322 = vadd.xlane.f32.xlu1 %v321_v54  ;;  %274 = vadd.xlane.f32.xlu0 %v273_v55  ;;  %v434_v54 = vmul.f32 %v1802_v44, %v1802_v44  ;;  %v370_v55 = vmul.f32 %v1807_v45, %v1807_v45 }
  0x57   :  { %325 = vadd.xlane.f32.xlu1 %v324_v58  ;;  %277 = vadd.xlane.f32.xlu0 %v276_v59  ;;  %v480_v58 = vsel %vm242_vm0, %v434_v54, 0.0  ;;  %v416_v59 = vsel %vm242_vm0, %v370_v55, 0.0 }
  0x5b   :  { %466 = vadd.xlane.f32.xlu1 %v465_v62  ;;  %402 = vadd.xlane.f32.xlu0 %v401_v63 }
  0x5f   :  { %469 = vadd.xlane.f32.xlu1 %v468_v8  ;;  %405 = vadd.xlane.f32.xlu0 %v404_v9 }
  0x63   :  { %328 = vadd.xlane.f32.xlu1 %v327_v12  ;;  %280 = vadd.xlane.f32.xlu0 %v279_v13 }
  0x67   :  { %331 = vadd.xlane.f32.xlu1 %v330_v22  ;;  %283 = vadd.xlane.f32.xlu0 %v282_v23 }
  0x6b   :  { %472 = vadd.xlane.f32.xlu1 %v471_v26  ;;  %408 = vadd.xlane.f32.xlu0 %v407_v27 }
  0x6f   :  { %475 = vadd.xlane.f32.xlu1 %v474_v30  ;;  %411 = vadd.xlane.f32.xlu0 %v410_v31 }
  0x73   :  { %334 = vadd.xlane.f32.xlu1 %v333_v42  ;;  %286 = vadd.xlane.f32.xlu0 %v285_v43 }
  0x77   :  { %337 = vadd.xlane.f32.xlu1 %v336_v46  ;;  %289 = vadd.xlane.f32.xlu0 %v288_v47 }
  0x7b   :  { %478 = vadd.xlane.f32.xlu1 %v477_v50  ;;  %414 = vadd.xlane.f32.xlu0 %v413_v51 }
  0x7f   :  { %481 = vadd.xlane.f32.xlu1 %v480_v58  ;;  %417 = vadd.xlane.f32.xlu0 %v416_v59 }
  0x90   :  { %v248_v60 = vpop.xlane.xlu1 %247  ;;  %v245_v61 = vpop.xlane.xlu0 %244 }
  0x94   :  { %v296_v62 = vpop.xlane.xlu1 %295  ;;  %v293_v63 = vpop.xlane.xlu0 %292 }
  0x95   :  { %v339_v3 = vadd.f32 %v293_v63, %v245_v61  ;;  %v340_v4 = vadd.f32 %v296_v62, %v248_v60 }
  0x97   :  { %v499_v8 = vmul.f32 0.0078125, %v339_v3  ;;  %v500_v22 = vmul.f32 0.0078125, %v340_v4 }
  0x98   :  { %v437_v9 = vpop.xlane.xlu1 %436  ;;  %v373_v12 = vpop.xlane.xlu0 %372 }
  0x99   :  { %v483_v13 = vadd.f32 %v437_v9, %v373_v12  ;;  %v531_v23 = vmul.f32 %v499_v8, %v499_v8  ;;  %v532_v30 = vmul.f32 %v500_v22, %v500_v22  ;;  %v643_v12 = vsub.f32 %v1479_v5, %v499_v8 }
  0x9b   :  { %v515_v24 = vmul.f32 0.0078125, %v483_v13  ;;  %v611_v13 = vsub.f32 %v1465_v1, %v499_v8 }
  0x9c   :  { %v440_v25 = vpop.xlane.xlu1 %439  ;;  %v376_v26 = vpop.xlane.xlu0 %375 }
  0x9d   :  { %v547_v27 = vsub.f32 %v515_v24, %v531_v23  ;;  %v484_v28 = vadd.f32 %v440_v25, %v376_v26 }
  0x9f   :  { %v563_v29 = vmax.f32 %v547_v27, 0.0  ;;  %v516_v31 = vmul.f32 0.0078125, %v484_v28 }
  0xa0   :  { %v299_v42 = vpop.xlane.xlu1 %298  ;;  %v251_v43 = vpop.xlane.xlu0 %250 }
  0xa1   :  { %v579_v46 = vadd.f32 1e-05, %v563_v29  ;;  %v548_v47 = vsub.f32 %v516_v31, %v532_v30  ;;  %v341_v49 = vadd.f32 %v299_v42, %v251_v43  ;;  %v612_v31 = vsub.f32 %v1460_v0, %v500_v22 }
  0xa2   :  { %v644_v42 = vsub.f32 %v1470_v2, %v500_v22 }
  0xa3   :  { %1368 = vrsqrt.f32 %v579_v46  ;;  %v564_v48 = vmax.f32 %v548_v47, 0.0  ;;  %v501_v55 = vmul.f32 0.0078125, %v341_v49 }
  0xa4   :  { %v302_v50 = vpop.xlane.xlu1 %301  ;;  %v254_v51 = vpop.xlane.xlu0 %253 }
  0xa5   :  { %v580_v54 = vadd.f32 1e-05, %v564_v48  ;;  %v342_v58 = vadd.f32 %v302_v50, %v254_v51  ;;  %v533_v63 = vmul.f32 %v501_v55, %v501_v55 }
  0xa7   :  { %1370 = vrsqrt.f32 %v580_v54  ;;  %v1825_v62 = vmul.f32 0.0078125, %v342_v58 }
  0xa8   :  { %v443_v59 = vpop.xlane.xlu1 %442  ;;  %v379_v60 = vpop.xlane.xlu0 %378 }
  0xa9   :  { %v485_v61 = vadd.f32 %v443_v59, %v379_v60  ;;  %v534_v29 = vmul.f32 %v1825_v62, %v1825_v62 }
  0xab   :  { %v517_v3 = vmul.f32 0.0078125, %v485_v61 }
  0xac   :  { %v446_v4 = vpop.xlane.xlu1 %445  ;;  %v382_v9 = vpop.xlane.xlu0 %381 }
  0xad   :  { %v1369_v23 = vpop.eup %1368  ;;  %v549_v24 = vsub.f32 %v517_v3, %v533_v63  ;;  %v486_v25 = vadd.f32 %v446_v4, %v382_v9  ;;  %v613_v4 = vsub.f32 %v1505_v17, %v501_v55  ;;  %v645_v9 = vsub.f32 %v1500_v16, %v501_v55 }
  0xae   :  { %v659_v26 = vmul.f32 %v1369_v23, %v643_v12  ;;  %v627_v27 = vmul.f32 %v1369_v23, %v611_v13  ;;  %v646_v17 = vsub.f32 %v1514_v20, %v1825_v62 }
  0xaf   :  { %v565_v28 = vmax.f32 %v549_v24, 0.0  ;;  %v518_v30 = vmul.f32 0.0078125, %v486_v25 }
  0xb0   :  { %v305_v43 = vpop.xlane.xlu1 %304  ;;  %1253 = vmatprep.mubr.msk.f32.mxu1 %vm242_vm0, %v659_v26  ;;  %1293 = vmatprep.mubr.msk.f32.mxu0 %vm242_vm0, %v627_v27  ;;  %v257_v1 = vpop.xlane.xlu0 %256 }
  0xb1   :  { %v1371_v5 = vpop.eup %1370  ;;  %v581_v8 = vadd.f32 1e-05, %v565_v28  ;;  %v550_v46 = vsub.f32 %v518_v30, %v534_v29  ;;  %v343_v50 = vadd.f32 %v305_v43, %v257_v1 }
  0xb2   :  { %v660_v47 = vmul.f32 %v1371_v5, %v644_v42  ;;  %v628_v48 = vmul.f32 %v1371_v5, %v612_v31  ;;  %v614_v31 = vsub.f32 %v1519_v21, %v1825_v62 }
  0xb3   :  { %1372 = vrsqrt.f32 %v581_v8  ;;  %v566_v49 = vmax.f32 %v550_v46, 0.0  ;;  %v503_v22 = vmul.f32 0.0078125, %v343_v50 }
  0xb4   :  { %v308_v51 = vpop.xlane.xlu1 %307  ;;  %1254 = vmatmul.mubr.msk.f32.vlgmr.msra.gmra.mrb[0].mxu1 %vm242_vm0, %v660_v47  ;;  %1294 = vmatmul.mubr.msk.f32.vlgmr.msra.gmra.mrb[0].mxu0 %vm242_vm0, %v628_v48  ;;  %v260_v0 = vpop.xlane.xlu0 %259 }
  0xb5   :  { %v582_v2 = vadd.f32 1e-05, %v566_v49  ;;  %v344_v54 = vadd.f32 %v308_v51, %v260_v0  ;;  %v535_v63 = vmul.f32 %v503_v22, %v503_v22 }
  0xb7   :  { %1374 = vrsqrt.f32 %v582_v2  ;;  %v1837_v61 = vmul.f32 0.0078125, %v344_v54 }
  0xb8   :  { %v449_v58 = vpop.xlane.xlu1 %448  ;;  %v385_v59 = vpop.xlane.xlu0 %384 }
  0xb9   :  { %v487_v60 = vadd.f32 %v449_v58, %v385_v59  ;;  %v536_v29 = vmul.f32 %v1837_v61, %v1837_v61  ;;  %v615_v59 = vsub.f32 %v1545_v33, %v503_v22  ;;  %v648_v33 = vsub.f32 %v1554_v36, %v1837_v61 }
  0xbb   :  { %v519_v3 = vmul.f32 0.0078125, %v487_v60  ;;  %v647_v60 = vsub.f32 %v1540_v32, %v503_v22 }
  0xbc   :  { %v452_v12 = vpop.xlane.xlu1 %451  ;;  %v388_v13 = vpop.xlane.xlu0 %387 }
  0xbd   :  { %v1373_v23 = vpop.eup %1372  ;;  %v551_v24 = vsub.f32 %v519_v3, %v535_v63  ;;  %v488_v25 = vadd.f32 %v452_v12, %v388_v13 }
  0xbe   :  { %v661_v26 = vmul.f32 %v1373_v23, %v645_v9  ;;  %v629_v27 = vmul.f32 %v1373_v23, %v613_v4 }
  0xbf   :  { %v567_v28 = vmax.f32 %v551_v24, 0.0  ;;  %v520_v30 = vmul.f32 0.0078125, %v488_v25 }
  0xc0   :  { %v311_v42 = vpop.xlane.xlu1 %310  ;;  %1256 = vmatprep.mubr.msk.f32.mxu1 %vm242_vm0, %v661_v26  ;;  %1296 = vmatprep.mubr.msk.f32.mxu0 %vm242_vm0, %v629_v27  ;;  %v263_v16 = vpop.xlane.xlu0 %262  ;;  %v616_v27 = vsub.f32 %v1559_v37, %v1837_v61 }
  0xc1   :  { %v1375_v55 = vpop.eup %1374  ;;  %v583_v43 = vadd.f32 1e-05, %v567_v28  ;;  %v552_v1 = vsub.f32 %v520_v30, %v536_v29  ;;  %v345_v47 = vadd.f32 %v311_v42, %v263_v16 }
  0xc2   :  { %v662_v5 = vmul.f32 %v1375_v55, %v646_v17  ;;  %v630_v8 = vmul.f32 %v1375_v55, %v614_v31 }
  0xc3   :  { %1376 = vrsqrt.f32 %v583_v43  ;;  %v568_v46 = vmax.f32 %v552_v1, 0.0  ;;  %v505_v62 = vmul.f32 0.0078125, %v345_v47 }
  0xc4   :  { %v314_v48 = vpop.xlane.xlu1 %313  ;;  %1257 = vmatmul.mubr.msk.f32.gmra.mrb[2].mxu1 %vm242_vm0, %v662_v5  ;;  %1297 = vmatmul.mubr.msk.f32.gmra.mrb[2].mxu0 %vm242_vm0, %v630_v8  ;;  %v266_v20 = vpop.xlane.xlu0 %265 }
  0xc5   :  { %v584_v21 = vadd.f32 1e-05, %v568_v46  ;;  %v346_v49 = vadd.f32 %v314_v48, %v266_v20  ;;  %v537_v54 = vmul.f32 %v505_v62, %v505_v62  ;;  %v617_v20 = vsub.f32 %v1621_v7, %v505_v62 }
  0xc7   :  { %1378 = vrsqrt.f32 %v584_v21  ;;  %v1851_v2 = vmul.f32 0.0078125, %v346_v49  ;;  %v649_v21 = vsub.f32 %v1616_v6, %v505_v62 }
  0xc8   :  { %v455_v50 = vpop.xlane.xlu1 %454  ;;  %v391_v51 = vpop.xlane.xlu0 %390 }
  0xc9   :  { %v489_v0 = vadd.f32 %v455_v50, %v391_v51  ;;  %v538_v25 = vmul.f32 %v1851_v2, %v1851_v2  ;;  %v650_v7 = vsub.f32 %v1642_v18, %v1851_v2 }
  0xcb   :  { %v521_v58 = vmul.f32 0.0078125, %v489_v0 }
  0xcc   :  { %v458_v63 = vpop.xlane.xlu1 %457  ;;  %v394_v3 = vpop.xlane.xlu0 %393 }
  0xcd   :  { %v1377_v4 = vpop.eup %1376  ;;  %v553_v9 = vsub.f32 %v521_v58, %v537_v54  ;;  %v490_v12 = vadd.f32 %v458_v63, %v394_v3 }
  0xce   :  { %v663_v13 = vmul.f32 %v1377_v4, %v647_v60  ;;  %v631_v23 = vmul.f32 %v1377_v4, %v615_v59  ;;  %v618_v4 = vsub.f32 %v1647_v19, %v1851_v2 }
  0xcf   :  { %v569_v24 = vmax.f32 %v553_v9, 0.0  ;;  %v522_v26 = vmul.f32 0.0078125, %v490_v12 }
  0xd0   :  { %v317_v28 = vpop.xlane.xlu1 %316  ;;  %1259 = vmatprep.mubr.msk.f32.mxu1 %vm242_vm0, %v663_v13  ;;  %1299 = vmatprep.mubr.msk.f32.mxu0 %vm242_vm0, %v631_v23  ;;  %v269_v32 = vpop.xlane.xlu0 %268 }
  0xd1   :  { %v1379_v22 = vpop.eup %1378  ;;  %v585_v29 = vadd.f32 1e-05, %v569_v24  ;;  %v554_v30 = vsub.f32 %v522_v26, %v538_v25  ;;  %v347_v16 = vadd.f32 %v317_v28, %v269_v32 }
  0xd2   :  { %v664_v31 = vmul.f32 %v1379_v22, %v648_v33  ;;  %v632_v17 = vmul.f32 %v1379_v22, %v616_v27 }
  0xd3   :  { %1380 = vrsqrt.f32 %v585_v29  ;;  %v570_v42 = vmax.f32 %v554_v30, 0.0  ;;  %v507_v61 = vmul.f32 0.0078125, %v347_v16 }
  0xd4   :  { %v320_v55 = vpop.xlane.xlu1 %319  ;;  %1260 = vmatmul.mubr.msk.f32.gmra.mrb[4].mxu1 %vm242_vm0, %v664_v31  ;;  %1300 = vmatmul.mubr.msk.f32.gmra.mrb[4].mxu0 %vm242_vm0, %v632_v17  ;;  %v272_v36 = vpop.xlane.xlu0 %271 }
  0xd5   :  { %v586_v37 = vadd.f32 1e-05, %v570_v42  ;;  %v348_v43 = vadd.f32 %v320_v55, %v272_v36  ;;  %v539_v47 = vmul.f32 %v507_v61, %v507_v61  ;;  %v619_v17 = vsub.f32 %v1673_v35, %v507_v61 }
  0xd6   :  { %v651_v42 = vsub.f32 %v1668_v34, %v507_v61 }
  0xd7   :  { %1382 = vrsqrt.f32 %v586_v37  ;;  %v1865_v46 = vmul.f32 0.0078125, %v348_v43 }
  0xd8   :  { %v461_v1 = vpop.xlane.xlu1 %460  ;;  %v397_v5 = vpop.xlane.xlu0 %396 }
  0xd9   :  { %v491_v8 = vadd.f32 %v461_v1, %v397_v5  ;;  %v540_v63 = vmul.f32 %v1865_v46, %v1865_v46  ;;  %v652_v35 = vsub.f32 %v1682_v40, %v1865_v46 }
  0xdb   :  { %v523_v48 = vmul.f32 0.0078125, %v491_v8 }
  0xdc   :  { %v464_v49 = vpop.xlane.xlu1 %463  ;;  %v400_v50 = vpop.xlane.xlu0 %399 }
  0xdd   :  { %v1381_v51 = vpop.eup %1380  ;;  %v555_v0 = vsub.f32 %v523_v48, %v539_v47  ;;  %v492_v54 = vadd.f32 %v464_v49, %v400_v50 }
  0xde   :  { %v665_v58 = vmul.f32 %v1381_v51, %v649_v21  ;;  %v633_v59 = vmul.f32 %v1381_v51, %v617_v20  ;;  %v620_v20 = vsub.f32 %v1687_v41, %v1865_v46 }
  0xdf   :  { %v571_v60 = vmax.f32 %v555_v0, 0.0  ;;  %v524_v3 = vmul.f32 0.0078125, %v492_v54 }
  0xe0   :  { %v323_v9 = vpop.xlane.xlu1 %322  ;;  %1262 = vmatprep.mubr.msk.f32.mxu1 %vm242_vm0, %v665_v58  ;;  %1302 = vmatprep.mubr.msk.f32.mxu0 %vm242_vm0, %v633_v59  ;;  %v275_v6 = vpop.xlane.xlu0 %274 }
  0xe1   :  { %v1383_v62 = vpop.eup %1382  ;;  %v587_v12 = vadd.f32 1e-05, %v571_v60  ;;  %v556_v13 = vsub.f32 %v524_v3, %v540_v63  ;;  %v349_v26 = vadd.f32 %v323_v9, %v275_v6 }
  0xe2   :  { %v666_v23 = vmul.f32 %v1383_v62, %v650_v7  ;;  %v634_v24 = vmul.f32 %v1383_v62, %v618_v4 }
  0xe3   :  { %1384 = vrsqrt.f32 %v587_v12  ;;  %v572_v25 = vmax.f32 %v556_v13, 0.0  ;;  %v509_v2 = vmul.f32 0.0078125, %v349_v26 }
  0xe4   :  { %v326_v27 = vpop.xlane.xlu1 %325  ;;  %1263 = vmatmul.mubr.msk.f32.gmra.mrb[6].mxu1 %vm242_vm0, %v666_v23  ;;  %1303 = vmatmul.mubr.msk.f32.gmra.mrb[6].mxu0 %vm242_vm0, %v634_v24  ;;  %v278_v18 = vpop.xlane.xlu0 %277 }
  0xe5   :  { %v588_v19 = vadd.f32 1e-05, %v572_v25  ;;  %v350_v33 = vadd.f32 %v326_v27, %v278_v18  ;;  %v541_v30 = vmul.f32 %v509_v2, %v509_v2  ;;  %v621_v62 = vsub.f32 %v1713_v53, %v509_v2 }
  0xe6   :  { %v653_v12 = vsub.f32 %v1708_v52, %v509_v2 }
  0xe7   :  { %1386 = vrsqrt.f32 %v588_v19  ;;  %v1879_v29 = vmul.f32 0.0078125, %v350_v33 }
  0xe8   :  { %v467_v28 = vpop.xlane.xlu1 %466  ;;  %v403_v32 = vpop.xlane.xlu0 %402 }
  0xe9   :  { %v493_v22 = vadd.f32 %v467_v28, %v403_v32  ;;  %v542_v47 = vmul.f32 %v1879_v29, %v1879_v29  ;;  %v622_v32 = vsub.f32 %v1727_v57, %v1879_v29  ;;  %v654_v53 = vsub.f32 %v1722_v56, %v1879_v29 }
  0xeb   :  { %v525_v31 = vmul.f32 0.0078125, %v493_v22 }
  0xec   :  { %v470_v16 = vpop.xlane.xlu1 %469  ;;  %v406_v55 = vpop.xlane.xlu0 %405 }
  0xed   :  { %v1385_v36 = vpop.eup %1384  ;;  %v557_v37 = vsub.f32 %v525_v31, %v541_v30  ;;  %v494_v43 = vadd.f32 %v470_v16, %v406_v55 }
  0xee   :  { %v667_v1 = vmul.f32 %v1385_v36, %v651_v42  ;;  %v635_v5 = vmul.f32 %v1385_v36, %v619_v17 }
  0xef   :  { %v573_v8 = vmax.f32 %v557_v37, 0.0  ;;  %v526_v48 = vmul.f32 0.0078125, %v494_v43 }
  0xf0   :  { %v329_v21 = vpop.xlane.xlu1 %328  ;;  %1265 = vmatprep.mubr.msk.f32.mxu1 %vm242_vm0, %v667_v1  ;;  %1305 = vmatprep.mubr.msk.f32.mxu0 %vm242_vm0, %v635_v5  ;;  %v281_v34 = vpop.xlane.xlu0 %280 }
  0xf1   :  { %v1387_v61 = vpop.eup %1386  ;;  %v589_v49 = vadd.f32 1e-05, %v573_v8  ;;  %v558_v50 = vsub.f32 %v526_v48, %v542_v47  ;;  %v351_v58 = vadd.f32 %v329_v21, %v281_v34 }
  0xf2   :  { %v668_v51 = vmul.f32 %v1387_v61, %v652_v35  ;;  %v636_v0 = vmul.f32 %v1387_v61, %v620_v20 }
  0xf3   :  { %1388 = vrsqrt.f32 %v589_v49  ;;  %v574_v54 = vmax.f32 %v558_v50, 0.0  ;;  %v511_v46 = vmul.f32 0.0078125, %v351_v58 }
  0xf4   :  { %v332_v59 = vpop.xlane.xlu1 %331  ;;  %1266 = vmatmul.mubr.msk.f32.gmra.mrb[8].mxu1 %vm242_vm0, %v668_v51  ;;  %1306 = vmatmul.mubr.msk.f32.gmra.mrb[8].mxu0 %vm242_vm0, %v636_v0  ;;  %v284_v40 = vpop.xlane.xlu0 %283 }
  0xf5   :  { %v590_v41 = vadd.f32 1e-05, %v574_v54  ;;  %v352_v60 = vadd.f32 %v332_v59, %v284_v40  ;;  %v543_v9 = vmul.f32 %v511_v46, %v511_v46  ;;  %v623_v20 = vsub.f32 %v1753_v11, %v511_v46 }
  0xf6   :  { %v655_v35 = vsub.f32 %v1748_v10, %v511_v46 }
  0xf7   :  { %1390 = vrsqrt.f32 %v590_v41  ;;  %v1893_v7 = vmul.f32 0.0078125, %v352_v60 }
  0xf8   :  { %v473_v63 = vpop.xlane.xlu1 %472  ;;  %v409_v3 = vpop.xlane.xlu0 %408 }
  0xf9   :  { %v495_v4 = vadd.f32 %v473_v63, %v409_v3  ;;  %v544_v33 = vmul.f32 %v1893_v7, %v1893_v7  ;;  %v624_v40 = vsub.f32 %v1767_v15, %v1893_v7  ;;  %v656_v41 = vsub.f32 %v1762_v14, %v1893_v7 }
  0xfb   :  { %v527_v6 = vmul.f32 0.0078125, %v495_v4 }
  0xfc   :  { %v476_v13 = vpop.xlane.xlu1 %475  ;;  %v412_v23 = vpop.xlane.xlu0 %411 }
  0xfd   :  { %v1389_v24 = vpop.eup %1388  ;;  %v559_v25 = vsub.f32 %v527_v6, %v543_v9  ;;  %v496_v26 = vadd.f32 %v476_v13, %v412_v23 }
  0xfe   :  { %v669_v27 = vmul.f32 %v1389_v24, %v653_v12  ;;  %v637_v18 = vmul.f32 %v1389_v24, %v621_v62 }
  0xff   :  { %v575_v19 = vmax.f32 %v559_v25, 0.0  ;;  %v528_v28 = vmul.f32 0.0078125, %v496_v26  ;;  %v1928_v25 = vld [vmem:[%s1962_s4] ss:$0 sm:$0xff]  ;;  %s1424_s4 = smov [#allocation4]  }
 0x100   :  { %v335_v22 = vpop.xlane.xlu1 %334  ;;  %1268 = vmatprep.mubr.msk.f32.mxu1 %vm242_vm0, %v669_v27  ;;  %1308 = vmatprep.mubr.msk.f32.mxu0 %vm242_vm0, %v637_v18  ;;  %v287_v52 = vpop.xlane.xlu0 %286  ;;  %s1121_s10 = sshll.u32 %s1424_s4, 4  ;;  %s1122_s10 = int_to_ptr.vmem [resolvable:$true] %s1121_s10 }
 0x101   :  { %v1391_v2 = vpop.eup %1390  ;;  %v591_v30 = vadd.f32 1e-05, %v575_v19  ;;  %v560_v31 = vsub.f32 %v528_v28, %v544_v33  ;;  %v353_v55 = vadd.f32 %v335_v22, %v287_v52  ;;  %s1400_s11 = scalar_lea.vmem %s1122_s10, 2048  ;;  %p1405_p1 = scmp.lt.s32.totalorder %s1122_s10, %s1122_s10 }
 0x102   :  { %v670_v17 = vmul.f32 %v1391_v2, %v654_v53  ;;  %v638_v42 = vmul.f32 %v1391_v2, %v622_v32  ;;  %p1401_p0 = scmp.ne.s32.totalorder %s1122_s10, %s1400_s11  ;;  %p1406_p2 = scmp.lt.s32.totalorder %s1400_s11, %s1400_s11 }
 0x103   :  { %1392 = vrsqrt.f32 %v591_v30  ;;  %v576_v16 = vmax.f32 %v560_v31, 0.0  ;;  %v513_v29 = vmul.f32 0.0078125, %v353_v55 }
 0x104   :  { %v338_v36 = vpop.xlane.xlu1 %337  ;;  %1269 = vmatmul.mubr.msk.f32.gmra.mrb[10].mxu1 %vm242_vm0, %v670_v17  ;;  %1309 = vmatmul.mubr.msk.f32.gmra.mrb[10].mxu0 %vm242_vm0, %v638_v42  ;;  %v290_v56 = vpop.xlane.xlu0 %289  ;;  %p1407_p3 = por %p1406_p2, %p1405_p1 }
 0x105   :  { %v592_v57 = vadd.f32 1e-05, %v576_v16  ;;  %v354_v37 = vadd.f32 %v338_v36, %v290_v56  ;;  %v545_v47 = vmul.f32 %v513_v29, %v513_v29  ;;  %v625_v15 = vsub.f32 %v1793_v39, %v513_v29 }
 0x106   :  { %v657_v14 = vsub.f32 %v1788_v38, %v513_v29  ;;  %p1408_p4 = pnand %p1407_p3, %p1401_p0 }
 0x107   :  { %1394 = vrsqrt.f32 %v592_v57  ;;  %v514_v8 = vmul.f32 0.0078125, %v354_v37 }
 0x108   :  { %v479_v43 = vpop.xlane.xlu1 %478  ;;  %v415_v1 = vpop.xlane.xlu0 %414 }
 0x109   :  { %v497_v5 = vadd.f32 %v479_v43, %v415_v1  ;;  %v546_v58 = vmul.f32 %v514_v8, %v514_v8  ;;  %v626_v62 = vsub.f32 %v1807_v45, %v514_v8  ;;  %v658_v12 = vsub.f32 %v1802_v44, %v514_v8 }
 0x10b   :  { %v529_v48 = vmul.f32 0.0078125, %v497_v5 }
 0x10c   :  { %v482_v21 = vpop.xlane.xlu1 %481  ;;  %v418_v34 = vpop.xlane.xlu0 %417 }
 0x10d   :  { %v1393_v61 = vpop.eup %1392  ;;  %v561_v49 = vsub.f32 %v529_v48, %v545_v47  ;;  %v498_v50 = vadd.f32 %v482_v21, %v418_v34 }
 0x10e   :  { %v671_v51 = vmul.f32 %v1393_v61, %v655_v35  ;;  %v639_v0 = vmul.f32 %v1393_v61, %v623_v20 }
 0x10f   :  { %v577_v54 = vmax.f32 %v561_v49, 0.0  ;;  %v530_v59 = vmul.f32 0.0078125, %v498_v50 }
 0x110   :  { %1271 = vmatprep.mubr.msk.f32.mxu1 %vm242_vm0, %v671_v51  ;;  %1311 = vmatprep.mubr.msk.f32.mxu0 %vm242_vm0, %v639_v0 }
 0x111   :  { %v1395_v10 = vpop.eup %1394  ;;  %v593_v11 = vadd.f32 1e-05, %v577_v54  ;;  %v562_v46 = vsub.f32 %v530_v59, %v546_v58 }
 0x112   :  { %v672_v60 = vmul.f32 %v1395_v10, %v656_v41  ;;  %v640_v63 = vmul.f32 %v1395_v10, %v624_v40 }
 0x113   :  { %1396 = vrsqrt.f32 %v593_v11  ;;  %v578_v3 = vmax.f32 %v562_v46, 0.0 }
 0x114   :  { %1272 = vmatmul.mubr.msk.f32.gmra.mrb[12].mxu1 %vm242_vm0, %v672_v60  ;;  %1312 = vmatmul.mubr.msk.f32.gmra.mrb[12].mxu0 %vm242_vm0, %v640_v63 }
 0x115   :  { %v594_v4 = vadd.f32 1e-05, %v578_v3 }
 0x117   :  { %1398 = vrsqrt.f32 %v594_v4 }
 0x11d   :  { %v1397_v7 = vpop.eup %1396 }
 0x11e   :  { %v673_v9 = vmul.f32 %v1397_v7, %v657_v14  ;;  %v641_v6 = vmul.f32 %v1397_v7, %v625_v15 }
 0x120   :  { %1274 = vmatprep.mubr.msk.f32.mxu1 %vm242_vm0, %v673_v9  ;;  %1314 = vmatprep.mubr.msk.f32.mxu0 %vm242_vm0, %v641_v6 }
 0x121   :  { %v1399_v13 = vpop.eup %1398 }
 0x122   :  { %v674_v23 = vmul.f32 %v1399_v13, %v658_v12  ;;  %v642_v24 = vmul.f32 %v1399_v13, %v626_v62 }
 0x124   :  { %1275 = vmatmul.mubr.msk.f32.gmra.mrb[14].mxu1 %vm242_vm0, %v674_v23  ;;  %1315 = vmatmul.mubr.msk.f32.gmra.mrb[14].mxu0 %vm242_vm0, %v642_v24 }
 0x187   :  { %v1255_v39 = vpop.f32.mrb[0].mxu1  ;;  %v1295_v38 = vpop.f32.mrb[0].mxu0 }
 0x188   :  { %v1004_v45 = vadd.f32 %v1295_v38, %v1255_v39  ;;  %v805_v44 = vpop.f32.mrb[1].mxu1  ;;  %v998_v26 = vpop.f32.mrb[1].mxu0 }
 0x189   :  { %v999_v27 = vadd.f32 %v998_v26, %v805_v44 }
 0x18a   :  { %v1085_v18 = vadd.f32 %v1928_v25, %v1004_v45 }
 0x18b   :  { %v1084_v19 = vadd.f32 %v1928_v25, %v999_v27 }
 0x18c   :  { %1101 = vst [vmem:[#allocation4 + $0x8] sm:$0xff] %v1085_v18 }
 0x18d   :  { %1100 = vst [vmem:[#allocation4] sm:$0xff] %v1084_v19 }
 0x197   :  { %v1258_v33 = vpop.f32.mrb[2].mxu1  ;;  %v1298_v28 = vpop.f32.mrb[2].mxu0 }
 0x198   :  { %v1014_v32 = vadd.f32 %v1298_v28, %v1258_v33  ;;  %v815_v53 = vpop.f32.mrb[3].mxu1  ;;  %v1008_v22 = vpop.f32.mrb[3].mxu0 }
 0x199   :  { %v1009_v52 = vadd.f32 %v1008_v22, %v815_v53 }
 0x19a   :  { %v1087_v2 = vadd.f32 %v1928_v25, %v1014_v32 }
 0x19b   :  { %v1086_v30 = vadd.f32 %v1928_v25, %v1009_v52 }
 0x19c   :  { %1103 = vst [vmem:[#allocation4 + $0x18] sm:$0xff] %v1087_v2 }
 0x19d   :  { %1102 = vst [vmem:[#allocation4 + $0x10] sm:$0xff] %v1086_v30 }
 0x1a7   :  { %v1261_v31 = vpop.f32.mrb[4].mxu1  ;;  %v1301_v17 = vpop.f32.mrb[4].mxu0 }
 0x1a8   :  { %v1024_v42 = vadd.f32 %v1301_v17, %v1261_v31  ;;  %v825_v16 = vpop.f32.mrb[5].mxu1  ;;  %v1018_v55 = vpop.f32.mrb[5].mxu0 }
 0x1a9   :  { %v1019_v36 = vadd.f32 %v1018_v55, %v825_v16 }
 0x1aa   :  { %v1089_v56 = vadd.f32 %v1928_v25, %v1024_v42 }
 0x1ab   :  { %v1088_v57 = vadd.f32 %v1928_v25, %v1019_v36 }
 0x1ac   :  { %1105 = vst [vmem:[#allocation4 + $0x28] sm:$0xff] %v1089_v56 }
 0x1ad   :  { %1104 = vst [vmem:[#allocation4 + $0x20] sm:$0xff] %v1088_v57 }
 0x1b7   :  { %v1264_v29 = vpop.f32.mrb[6].mxu1  ;;  %v1304_v37 = vpop.f32.mrb[6].mxu0 }
 0x1b8   :  { %v1034_v43 = vadd.f32 %v1304_v37, %v1264_v29  ;;  %v835_v1 = vpop.f32.mrb[7].mxu1  ;;  %v1028_v5 = vpop.f32.mrb[7].mxu0 }
 0x1b9   :  { %v1029_v8 = vadd.f32 %v1028_v5, %v835_v1 }
 0x1ba   :  { %v1091_v47 = vadd.f32 %v1928_v25, %v1034_v43 }
 0x1bb   :  { %v1090_v48 = vadd.f32 %v1928_v25, %v1029_v8 }
 0x1bc   :  { %1107 = vst [vmem:[#allocation4 + $0x38] sm:$0xff] %v1091_v47 }
 0x1bd   :  { %1106 = vst [vmem:[#allocation4 + $0x30] sm:$0xff] %v1090_v48 }
 0x1c7   :  { %v1267_v20 = vpop.f32.mrb[8].mxu1  ;;  %v1307_v35 = vpop.f32.mrb[8].mxu0 }
 0x1c8   :  { %v1044_v21 = vadd.f32 %v1307_v35, %v1267_v20  ;;  %v845_v34 = vpop.f32.mrb[9].mxu1  ;;  %v1038_v61 = vpop.f32.mrb[9].mxu0 }
 0x1c9   :  { %v1039_v49 = vadd.f32 %v1038_v61, %v845_v34 }
 0x1ca   :  { %v1093_v50 = vadd.f32 %v1928_v25, %v1044_v21 }
 0x1cb   :  { %v1092_v51 = vadd.f32 %v1928_v25, %v1039_v49 }
 0x1cc   :  { %1109 = vst [vmem:[#allocation4 + $0x48] sm:$0xff] %v1093_v50 }
 0x1cd   :  { %1108 = vst [vmem:[#allocation4 + $0x40] sm:$0xff] %v1092_v51 }
 0x1d7   :  { %v1270_v0 = vpop.f32.mrb[10].mxu1  ;;  %v1310_v54 = vpop.f32.mrb[10].mxu0 }
 0x1d8   :  { %v1054_v58 = vadd.f32 %v1310_v54, %v1270_v0  ;;  %v855_v59 = vpop.f32.mrb[11].mxu1  ;;  %v1048_v40 = vpop.f32.mrb[11].mxu0 }
 0x1d9   :  { %v1049_v41 = vadd.f32 %v1048_v40, %v855_v59 }
 0x1da   :  { %v1095_v10 = vadd.f32 %v1928_v25, %v1054_v58 }
 0x1db   :  { %v1094_v11 = vadd.f32 %v1928_v25, %v1049_v41 }
 0x1dc   :  { %1111 = vst [vmem:[#allocation4 + $0x58] sm:$0xff] %v1095_v10 }
 0x1dd   :  { %1110 = vst [vmem:[#allocation4 + $0x50] sm:$0xff] %v1094_v11 }
 0x1e7   :  { %v1273_v46 = vpop.f32.mrb[12].mxu1  ;;  %v1313_v60 = vpop.f32.mrb[12].mxu0 }
 0x1e8   :  { %v1064_v63 = vadd.f32 %v1313_v60, %v1273_v46  ;;  %v865_v3 = vpop.f32.mrb[13].mxu1  ;;  %v1058_v4 = vpop.f32.mrb[13].mxu0 }
 0x1e9   :  { %v1059_v15 = vadd.f32 %v1058_v4, %v865_v3 }
 0x1ea   :  { %v1097_v14 = vadd.f32 %v1928_v25, %v1064_v63 }
 0x1eb   :  { %v1096_v7 = vadd.f32 %v1928_v25, %v1059_v15 }
 0x1ec   :  { %1113 = vst [vmem:[#allocation4 + $0x68] sm:$0xff] %v1097_v14 }
 0x1ed   :  { %1112 = vst [vmem:[#allocation4 + $0x60] sm:$0xff] %v1096_v7 }
 0x1f7   :  { %v1276_v9 = vpop.f32.mrb[14].mxu1  ;;  %v1316_v6 = vpop.f32.mrb[14].mxu0 }
 0x1f8   :  { %v1074_v62 = vadd.f32 %v1316_v6, %v1276_v9  ;;  %v875_v12 = vpop.f32.mrb[15].mxu1  ;;  %v1068_v13 = vpop.f32.mrb[15].mxu0 }
 0x1f9   :  { %v1069_v23 = vadd.f32 %v1068_v13, %v875_v12 }
 0x1fa   :  { %v1099_v24 = vadd.f32 %v1928_v25, %v1074_v62 }
 0x1fb   :  { %v1098_v39 = vadd.f32 %v1928_v25, %v1069_v23 }
 0x1fc   :  { %1115 = vst [vmem:[#allocation4 + $0x78] sm:$0xff] %v1099_v24 }
 0x1fd   :  { %1114 = vst [vmem:[#allocation4 + $0x70] sm:$0xff] %v1098_v39 }
 0x1fe   :  { %1411 = shalt.err (!%p1408_p4)
}
 0x1ff   :  { %s1412_s14 = scalar_lea.hbm %s1963_s5, 2048 }
 0x200   :  { %p1413_p5 = scmp.ne.s32.totalorder %s1963_s5, %s1412_s14  ;;  %p1416_p6 = scmp.lt.u32.totalorder %s1412_s14, %s1963_s5 }
 0x202   :  { %p1418_p7 = pnand %p1416_p6, %p1413_p5 }
 0x204   :  { %1421 = shalt.err (!%p1418_p7)
}
 0x205   :  { %s1425_s19 = smov 128   ;;  %s1426_s20 = smov 8  }
 0x206   :  { %1127 = dma.vmem_to_hbm [thread:$0]  %s1122_s10, 2048, %s1963_s5, [#allocation5], %s1425_s19, %s1425_s19, %s1426_s20  }
 0x207   :  { %1422 = dma.done.wait [#allocation5], 2048  }
 0x208   :  { %1423 = vsyncadd [#allocation5], 4294965248 }
 0x209   :  { %1131 = vsyncpa [#allocation5], 1 }

</bundles_post_ra>
